<compile_context>
chip_gen: v6e
topology: v6e:2x2x1
jax: 0.10.0
libtpu: 0.0.40
codegen_flags: <defaults>
</compile_context>

<pallas_src>
import jax
import jax.numpy as jnp
from jax.experimental import pallas as pl
from jax.experimental.pallas import tpu as pltpu

_LN_EPS = 1e-5  # PyTorch nn.LayerNorm default eps


def _residue_mlp_kernel(x_ref, ln_w_ref, ln_b_ref, w1_ref, b1_ref, w2_ref,
                        b2_ref, o_ref, xn_ref, acc_ref):
    d = pl.program_id(1)

    @pl.when(d == 0)
    def _():
        # --- LayerNorm (one-pass stats, f32) computed once per row-tile ---
        x = x_ref[...].astype(jnp.float32)
        inv_e = 1.0 / x.shape[-1]
        mean = jnp.sum(x, axis=-1, keepdims=True) * inv_e
        mean_sq = jnp.sum(x * x, axis=-1, keepdims=True) * inv_e
        var = jnp.maximum(mean_sq - mean * mean, 0.0)  # clamp: avoid rsqrt(<0)
        xn = (x - mean) * jax.lax.rsqrt(var + _LN_EPS)
        xn = (xn * ln_w_ref[...].astype(jnp.float32)
              + ln_b_ref[...].astype(jnp.float32))
        # Cache LN(x) in the matmul dtype (bf16 weights -> bf16 MXU path).
        xn_ref[...] = xn.astype(xn_ref.dtype)
        # Seed the accumulator with the residual and the final bias.
        acc_ref[...] = x + b2_ref[...].astype(jnp.float32)

    # --- Linear(E -> tile_d) + ReLU, then Linear(tile_d -> E), f32 accum ---
    h = jnp.dot(xn_ref[...], w1_ref[...], preferred_element_type=jnp.float32)
    h = jnp.maximum(h + b1_ref[...].astype(jnp.float32), 0.0)
    acc_ref[...] += jnp.dot(h.astype(w2_ref.dtype), w2_ref[...],
                            preferred_element_type=jnp.float32)

    @pl.when(d == pl.num_programs(1) - 1)
    def _():
        # Dropout(p=0) is the identity in this forward pass.
        o_ref[...] = acc_ref[...].astype(o_ref.dtype)


def _round_up(n, m):
    return ((n + m - 1) // m) * m


def _pick_tile_d(D, cap=2048):
    """Largest multiple of 128 that divides D and is <= cap, else D itself."""
    if D <= cap or D % 128 != 0:
        return D
    td = (cap // 128) * 128
    while td > 128 and D % td != 0:
        td -= 128
    return td if D % td == 0 else D


def _pick_tile_m(M, align, target=512):
    """~512-row tiles, minimal padding waste, >=2 steps for v7x dual-TC."""
    n = max(1, -(-M // target))
    if n == 1 and M > align:
        n = 2
    return _round_up(-(-M // n), align)


_VMEM_BUDGET = 40 << 20  # headroom under v7x's 64 MiB physical VMEM


def _vmem_bytes(tile_m, tile_d, E, x_bytes, w_bytes, nd):
    act = 2 * 2 * tile_m * E * x_bytes                        # dbl-buffered x + out
    wts = (2 if nd > 1 else 1) * (2 * E * tile_d + tile_d) * w_bytes  # w1/w2/b1 tiles
    wts += 2 * 3 * E * w_bytes                                # ln_w, ln_b, b2
    scr = tile_m * E * (w_bytes + 4)                          # xn cache + f32 acc
    tmp = tile_m * tile_d * 4                                 # h intermediate
    return act + wts + scr + tmp


def residue_mlp_pallas(x, params, *, tile_m=None, tile_d=None):
    """x: (..., E). Returns x + MLP(x), same shape and dtype as x."""
    *lead, E = x.shape
    x2 = x.reshape(-1, E)
    M = x2.shape[0]
    D = params["w1"].shape[1]

    x_bytes = x.dtype.itemsize
    w_dtype = params["w1"].dtype
    w_bytes = jnp.dtype(w_dtype).itemsize
    align = 16 if x_bytes == 2 else 8  # bf16 packs 16 rows per sublane tile

    if tile_d is None:
        tile_d = _pick_tile_d(D)
    if tile_m is None:
        tile_m = _pick_tile_m(M, align)
        # Shrink until the working set fits the v7x-safe VMEM budget.
        nd = D // tile_d
        while (_vmem_bytes(tile_m, tile_d, E, x_bytes, w_bytes, nd) > _VMEM_BUDGET
               and tile_d > 128 and (tile_d // 2) % 128 == 0
               and D % (tile_d // 2) == 0):
            tile_d //= 2
            nd = D // tile_d
        while (_vmem_bytes(tile_m, tile_d, E, x_bytes, w_bytes, nd) > _VMEM_BUDGET
               and tile_m > align):
            tile_m = max(align, _round_up(tile_m // 2, align))

    assert D % tile_d == 0, (D, tile_d)
    nd = D // tile_d

    m_pad = _round_up(M, tile_m)
    if m_pad != M:
        # Zero padding is safe: clamped var=0 -> rsqrt(eps) finite; rows sliced off.
        x2 = jnp.pad(x2, ((0, m_pad - M), (0, 0)))
    nm = m_pad // tile_m

    const = lambda i, d: (0, 0)
    grid_spec = pltpu.PrefetchScalarGridSpec(
        num_scalar_prefetch=0,
        grid=(nm, nd),                                       # reduction (D) axis last
        in_specs=[
            pl.BlockSpec((tile_m, E), lambda i, d: (i, 0)),  # x rows (resident over d)
            pl.BlockSpec((1, E), const),                     # LN gamma
            pl.BlockSpec((1, E), const),                     # LN beta
            pl.BlockSpec((E, tile_d), lambda i, d: (0, d)),  # w1 D-tile
            pl.BlockSpec((1, tile_d), lambda i, d: (0, d)),  # b1 D-tile
            pl.BlockSpec((tile_d, E), lambda i, d: (d, 0)),  # w2 D-tile
            pl.BlockSpec((1, E), const),                     # b2
        ],
        out_specs=pl.BlockSpec((tile_m, E), lambda i, d: (i, 0)),
        scratch_shapes=[
            pltpu.VMEM((tile_m, E), w_dtype),      # cached LN(x) in matmul dtype
            pltpu.VMEM((tile_m, E), jnp.float32),  # y accumulator (+ residual + b2)
        ],
    )

    est = _vmem_bytes(tile_m, tile_d, E, x_bytes, w_bytes, nd)
    vmem_limit = int(min(64 << 20, max(est + (8 << 20), 24 << 20)))

    cost = pl.CostEstimate(
        flops=4 * m_pad * E * D,
        transcendentals=m_pad,
        bytes_accessed=m_pad * E * 2 * x_bytes + (2 * E * D + D + 3 * E) * w_bytes,
    )

    out = pl.pallas_call(
        _residue_mlp_kernel,
        out_shape=jax.ShapeDtypeStruct((m_pad, E), x.dtype),
        grid_spec=grid_spec,
        compiler_params=pltpu.CompilerParams(
            dimension_semantics=("parallel", "arbitrary"),
            vmem_limit_bytes=vmem_limit,
        ),
        cost_estimate=cost,
    )(x2, params["ln_w"], params["ln_b"],
      params["w1"], params["b1"], params["w2"], params["b2"])

    return out[:M].reshape(*lead, E)


def init_params(key, embed_dim, inner_dim, dtype=jnp.float32):
    """Synthetic params matching ResidueMLP's shapes.

    PyTorch Linear weights are (out, in); stored transposed here for
    right-multiplication. LN affine params kept as (1, E) rows.
    """
    k1, k2, k3, k4, k5, k6 = jax.random.split(key, 6)
    s = 0.05
    return {
        "ln_w": (1.0 + s * jax.random.normal(k1, (1, embed_dim))).astype(dtype),
        "ln_b": (s * jax.random.normal(k2, (1, embed_dim))).astype(dtype),
        "w1":   (s * jax.random.normal(k3, (embed_dim, inner_dim))).astype(dtype),
        "b1":   (s * jax.random.normal(k4, (1, inner_dim))).astype(dtype),
        "w2":   (s * jax.random.normal(k5, (inner_dim, embed_dim))).astype(dtype),
        "b2":   (s * jax.random.normal(k6, (1, embed_dim))).astype(dtype),
    }


def residue_mlp_ref(x, params):
    """Pure-JAX reference mirroring the PyTorch forward exactly (dropout p=0)."""
    xf = x.astype(jnp.float32)
    mean = jnp.mean(xf, axis=-1, keepdims=True)
    var = jnp.mean((xf - mean) ** 2, axis=-1, keepdims=True)
    xn = (xf - mean) * jax.lax.rsqrt(var + _LN_EPS)
    xn = xn * params["ln_w"][0].astype(jnp.float32) + params["ln_b"][0].astype(jnp.float32)
    h = jnp.maximum(xn @ params["w1"].astype(jnp.float32)
                    + params["b1"][0].astype(jnp.float32), 0.0)
    y = h @ params["w2"].astype(jnp.float32) + params["b2"][0].astype(jnp.float32)
    return (xf + y).astype(x.dtype)


if __name__ == "__main__":
    B, N, E, D = 2, 8, 32, 64  # batch, seq, embed_dim, inner_dim
    key = jax.random.PRNGKey(0)
    kx, kp = jax.random.split(key)

    x = jax.random.normal(kx, (B, N, E), dtype=jnp.float32)
    params = init_params(kp, E, D)

    out = jax.block_until_ready(residue_mlp_pallas(x, params))
    ref = residue_mlp_ref(x, params)
    assert out.shape == (B, N, E), out.shape
    assert jnp.allclose(out, ref, atol=1e-5, rtol=1e-5), \
        float(jnp.max(jnp.abs(out - ref)))

    # Row-padding path (M not a multiple of the sublane alignment).
    x2 = jax.random.normal(kx, (1, 5, E), dtype=jnp.float32)
    out2 = jax.block_until_ready(residue_mlp_pallas(x2, params))
    ref2 = residue_mlp_ref(x2, params)
    assert out2.shape == (1, 5, E), out2.shape
    assert jnp.allclose(out2, ref2, atol=1e-5, rtol=1e-5), \
        float(jnp.max(jnp.abs(out2 - ref2)))

    # D-tiled reduction path: nd > 1 accumulation steps over the inner dim.
    E2, D2 = 128, 256
    params_big = init_params(kp, E2, D2)
    x3 = jax.random.normal(kx, (B, N, E2), dtype=jnp.float32)
    out3 = jax.block_until_ready(residue_mlp_pallas(x3, params_big, tile_d=128))
    ref3 = residue_mlp_ref(x3, params_big)
    assert jnp.allclose(out3, ref3, atol=1e-4, rtol=1e-4), \
        float(jnp.max(jnp.abs(out3 - ref3)))

    # bf16 weights -> bf16 MXU path (f32 accumulation); looser tolerance.
    params_bf16 = init_params(kp, E, D, dtype=jnp.bfloat16)
    out4 = jax.block_until_ready(residue_mlp_pallas(x, params_bf16))
    ref4 = residue_mlp_ref(x, params_bf16)
    assert jnp.allclose(out4, ref4, atol=3e-2, rtol=3e-2), \
        float(jnp.max(jnp.abs(out4 - ref4)))

    print("KERNEL_OK")
</pallas_src>

<mosaic_0001>
module attributes {stable_mosaic.version = 11 : i64} {
  func.func @_residue_mlp_kernel(%arg0: i32, %arg1: i32, %arg2: memref<8x32xf32, #tpu.memory_space<vmem>>, %arg3: memref<1x32xf32, #tpu.memory_space<vmem>>, %arg4: memref<1x32xf32, #tpu.memory_space<vmem>>, %arg5: memref<32x64xf32, #tpu.memory_space<vmem>>, %arg6: memref<1x64xf32, #tpu.memory_space<vmem>>, %arg7: memref<64x32xf32, #tpu.memory_space<vmem>>, %arg8: memref<1x32xf32, #tpu.memory_space<vmem>>, %arg9: memref<8x32xf32, #tpu.memory_space<vmem>>, %arg10: memref<8x32xf32, #tpu.memory_space<vmem>>, %arg11: memref<8x32xf32, #tpu.memory_space<vmem>>) attributes {dimension_semantics = [#tpu.dimension_semantics<parallel>, #tpu.dimension_semantics<arbitrary>], iteration_bounds = array<i64: 2, 1>, scalar_prefetch = 0 : i64, scratch_operands = 2 : i64, tpu.core_type = #tpu.core_type<tc>, window_params = [{transform_indices = @transform_0, window_bounds = array<i64: 8, 32>}, {pipeline_mode = #tpu.pipeline_mode<synchronous>, transform_indices = @transform_1, window_bounds = array<i64: 1, 32>}, {pipeline_mode = #tpu.pipeline_mode<synchronous>, transform_indices = @transform_2, window_bounds = array<i64: 1, 32>}, {transform_indices = @transform_3, window_bounds = array<i64: 32, 64>}, {transform_indices = @transform_4, window_bounds = array<i64: 1, 64>}, {transform_indices = @transform_5, window_bounds = array<i64: 64, 32>}, {pipeline_mode = #tpu.pipeline_mode<synchronous>, transform_indices = @transform_6, window_bounds = array<i64: 1, 32>}, {transform_indices = @transform_7, window_bounds = array<i64: 8, 32>}]} {
    %c0_i32 = arith.constant 0 : i32
    %0 = arith.cmpi eq, %arg1, %c0_i32 : i32
    %1 = arith.extui %0 : i1 to i32
    %c0_i32_0 = arith.constant 0 : i32
    %2 = arith.cmpi ne, %1, %c0_i32_0 : i32
    scf.if %2 {
      %c0_16 = arith.constant 0 : index
      %c0_17 = arith.constant 0 : index
      %19 = vector.load %arg2[%c0_16, %c0_17] : memref<8x32xf32, #tpu.memory_space<vmem>>, vector<8x32xf32>
      %cst_18 = arith.constant dense<0.000000e+00> : vector<8xf32>
      %20 = vector.multi_reduction <add>, %19, %cst_18 [1] : vector<8x32xf32> to vector<8xf32>
      %21 = vector.shape_cast %20 : vector<8xf32> to vector<8x1xf32>
      %cst_19 = arith.constant 3.125000e-02 : f32
      %22 = vector.broadcast %cst_19 : f32 to vector<8x1xf32>
      %23 = arith.mulf %21, %22 : vector<8x1xf32>
      %24 = arith.mulf %19, %19 : vector<8x32xf32>
      %cst_20 = arith.constant dense<0.000000e+00> : vector<8xf32>
      %25 = vector.multi_reduction <add>, %24, %cst_20 [1] : vector<8x32xf32> to vector<8xf32>
      %26 = vector.shape_cast %25 : vector<8xf32> to vector<8x1xf32>
      %cst_21 = arith.constant 3.125000e-02 : f32
      %27 = vector.broadcast %cst_21 : f32 to vector<8x1xf32>
      %28 = arith.mulf %26, %27 : vector<8x1xf32>
      %29 = arith.mulf %23, %23 : vector<8x1xf32>
      %30 = arith.subf %28, %29 : vector<8x1xf32>
      %cst_22 = arith.constant 0.000000e+00 : f32
      %31 = vector.broadcast %cst_22 : f32 to vector<8x1xf32>
      %32 = arith.maximumf %30, %31 : vector<8x1xf32>
      %33 = vector.broadcast %23 : vector<8x1xf32> to vector<8x32xf32>
      %34 = arith.subf %19, %33 : vector<8x32xf32>
      %cst_23 = arith.constant 9.99999974E-6 : f32
      %35 = vector.broadcast %cst_23 : f32 to vector<8x1xf32>
      %36 = arith.addf %32, %35 : vector<8x1xf32>
      %37 = math.rsqrt %36 : vector<8x1xf32>
      %38 = vector.broadcast %37 : vector<8x1xf32> to vector<8x32xf32>
      %39 = arith.mulf %34, %38 : vector<8x32xf32>
      %c0_24 = arith.constant 0 : index
      %c0_25 = arith.constant 0 : index
      %40 = vector.load %arg3[%c0_24, %c0_25] : memref<1x32xf32, #tpu.memory_space<vmem>>, vector<1x32xf32>
      %41 = vector.broadcast %40 : vector<1x32xf32> to vector<8x32xf32>
      %42 = arith.mulf %39, %41 : vector<8x32xf32>
      %c0_26 = arith.constant 0 : index
      %c0_27 = arith.constant 0 : index
      %43 = vector.load %arg4[%c0_26, %c0_27] : memref<1x32xf32, #tpu.memory_space<vmem>>, vector<1x32xf32>
      %44 = vector.broadcast %43 : vector<1x32xf32> to vector<8x32xf32>
      %45 = arith.addf %42, %44 : vector<8x32xf32>
      %c0_28 = arith.constant 0 : index
      %c0_29 = arith.constant 0 : index
      %46 = vector.load %arg10[%c0_28, %c0_29] : memref<8x32xf32, #tpu.memory_space<vmem>>, vector<8x32xf32>
      tpu.vector_store %arg10[%c0_28, %c0_29], %45 {strides = array<i32>} : memref<8x32xf32, #tpu.memory_space<vmem>>, vector<8x32xf32>,
      %c0_30 = arith.constant 0 : index
      %c0_31 = arith.constant 0 : index
      %47 = vector.load %arg8[%c0_30, %c0_31] : memref<1x32xf32, #tpu.memory_space<vmem>>, vector<1x32xf32>
      %48 = vector.broadcast %47 : vector<1x32xf32> to vector<8x32xf32>
      %49 = arith.addf %19, %48 : vector<8x32xf32>
      %c0_32 = arith.constant 0 : index
      %c0_33 = arith.constant 0 : index
      %50 = vector.load %arg11[%c0_32, %c0_33] : memref<8x32xf32, #tpu.memory_space<vmem>>, vector<8x32xf32>
      tpu.vector_store %arg11[%c0_32, %c0_33], %49 {strides = array<i32>} : memref<8x32xf32, #tpu.memory_space<vmem>>, vector<8x32xf32>,
    } else {
    }
    %c0 = arith.constant 0 : index
    %c0_1 = arith.constant 0 : index
    %3 = vector.load %arg10[%c0, %c0_1] : memref<8x32xf32, #tpu.memory_space<vmem>>, vector<8x32xf32>
    %c0_2 = arith.constant 0 : index
    %c0_3 = arith.constant 0 : index
    %4 = vector.load %arg5[%c0_2, %c0_3] : memref<32x64xf32, #tpu.memory_space<vmem>>, vector<32x64xf32>
    %cst = arith.constant dense<0.000000e+00> : vector<8x64xf32>
    %5 = tpu.matmul %3, %4, %cst {dimension_numbers = #tpu.dot_dimension_numbers<[1], [0], [0], [1], [0, 0, 1, 1], [], []>} : vector<8x32xf32>, vector<32x64xf32>, vector<8x64xf32> -> vector<8x64xf32>
    %c0_4 = arith.constant 0 : index
    %c0_5 = arith.constant 0 : index
    %6 = vector.load %arg6[%c0_4, %c0_5] : memref<1x64xf32, #tpu.memory_space<vmem>>, vector<1x64xf32>
    %7 = vector.broadcast %6 : vector<1x64xf32> to vector<8x64xf32>
    %8 = arith.addf %5, %7 : vector<8x64xf32>
    %cst_6 = arith.constant 0.000000e+00 : f32
    %9 = vector.broadcast %cst_6 : f32 to vector<8x64xf32>
    %10 = arith.maximumf %8, %9 : vector<8x64xf32>
    %c0_7 = arith.constant 0 : index
    %c0_8 = arith.constant 0 : index
    %11 = vector.load %arg11[%c0_7, %c0_8] : memref<8x32xf32, #tpu.memory_space<vmem>>, vector<8x32xf32>
    %c0_9 = arith.constant 0 : index
    %c0_10 = arith.constant 0 : index
    %12 = vector.load %arg7[%c0_9, %c0_10] : memref<64x32xf32, #tpu.memory_space<vmem>>, vector<64x32xf32>
    %cst_11 = arith.constant dense<0.000000e+00> : vector<8x32xf32>
    %13 = tpu.matmul %10, %12, %cst_11 {dimension_numbers = #tpu.dot_dimension_numbers<[1], [0], [0], [1], [0, 0, 1, 1], [], []>} : vector<8x64xf32>, vector<64x32xf32>, vector<8x32xf32> -> vector<8x32xf32>
    %14 = arith.addf %11, %13 : vector<8x32xf32>
    %c0_12 = arith.constant 0 : index
    %c0_13 = arith.constant 0 : index
    %15 = vector.load %arg11[%c0_12, %c0_13] : memref<8x32xf32, #tpu.memory_space<vmem>>, vector<8x32xf32>
    tpu.vector_store %arg11[%c0_12, %c0_13], %14 {strides = array<i32>} : memref<8x32xf32, #tpu.memory_space<vmem>>, vector<8x32xf32>,
    %c0_i32_14 = arith.constant 0 : i32
    %16 = arith.cmpi eq, %arg1, %c0_i32_14 : i32
    %17 = arith.extui %16 : i1 to i32
    %c0_i32_15 = arith.constant 0 : i32
    %18 = arith.cmpi ne, %17, %c0_i32_15 : i32
    scf.if %18 {
      %c0_16 = arith.constant 0 : index
      %c0_17 = arith.constant 0 : index
      %19 = vector.load %arg11[%c0_16, %c0_17] : memref<8x32xf32, #tpu.memory_space<vmem>>, vector<8x32xf32>
      %c0_18 = arith.constant 0 : index
      %c0_19 = arith.constant 0 : index
      %20 = vector.load %arg9[%c0_18, %c0_19] : memref<8x32xf32, #tpu.memory_space<vmem>>, vector<8x32xf32>
      tpu.vector_store %arg9[%c0_18, %c0_19], %19 {strides = array<i32>} : memref<8x32xf32, #tpu.memory_space<vmem>>, vector<8x32xf32>,
    } else {
    }
    return
  }
  func.func @transform_0(%arg0: i32, %arg1: i32) -> (i32, i32) {
    %c0_i32 = arith.constant 0 : i32
    %c0_i32_0 = arith.constant 0 : i32
    return %arg0, %c0_i32 : i32, i32
  }
  func.func @transform_1(%arg0: i32, %arg1: i32) -> (i32, i32) {
    %c0_i32 = arith.constant 0 : i32
    %c0_i32_0 = arith.constant 0 : i32
    %c0_i32_1 = arith.constant 0 : i32
    return %c0_i32, %c0_i32_0 : i32, i32
  }
  func.func @transform_2(%arg0: i32, %arg1: i32) -> (i32, i32) {
    %c0_i32 = arith.constant 0 : i32
    %c0_i32_0 = arith.constant 0 : i32
    %c0_i32_1 = arith.constant 0 : i32
    return %c0_i32, %c0_i32_0 : i32, i32
  }
  func.func @transform_3(%arg0: i32, %arg1: i32) -> (i32, i32) {
    %c0_i32 = arith.constant 0 : i32
    %c0_i32_0 = arith.constant 0 : i32
    return %c0_i32, %arg1 : i32, i32
  }
  func.func @transform_4(%arg0: i32, %arg1: i32) -> (i32, i32) {
    %c0_i32 = arith.constant 0 : i32
    %c0_i32_0 = arith.constant 0 : i32
    return %c0_i32, %arg1 : i32, i32
  }
  func.func @transform_5(%arg0: i32, %arg1: i32) -> (i32, i32) {
    %c0_i32 = arith.constant 0 : i32
    %c0_i32_0 = arith.constant 0 : i32
    return %arg1, %c0_i32 : i32, i32
  }
  func.func @transform_6(%arg0: i32, %arg1: i32) -> (i32, i32) {
    %c0_i32 = arith.constant 0 : i32
    %c0_i32_0 = arith.constant 0 : i32
    %c0_i32_1 = arith.constant 0 : i32
    return %c0_i32, %c0_i32_0 : i32, i32
  }
  func.func @transform_7(%arg0: i32, %arg1: i32) -> (i32, i32) {
    %c0_i32 = arith.constant 0 : i32
    %c0_i32_0 = arith.constant 0 : i32
    return %arg0, %c0_i32 : i32, i32
  }
}

</mosaic_0001>

<bundles_post_ra>
// kernel: tpu_custom_call.1
= control target key start
LH: loop header
LB: loop body
LE: loop exit
PB: predicated region body
PF: predicated region fallthrough
CT: control target
= control target key end

     0   :  { %12 = vsyncpa [#allocation5], 0  ;;  %s1091_s0 = inlined_call_operand.vmem [shape: f32[16,32], index: 0, kind: input, shape index: {}]   ;;  %s1092_s1 = inlined_call_operand.vmem [shape: f32[1,32], index: 1, kind: input, shape index: {}]   ;;  %s1093_s2 = inlined_call_operand.vmem [shape: f32[1,32], index: 2, kind: input, shape index: {}]   ;;  %s1094_s3 = inlined_call_operand.vmem [shape: f32[32,64], index: 3, kind: input, shape index: {}]   ;;  %s1095_s4 = inlined_call_operand.vmem [shape: f32[1,64], index: 4, kind: input, shape index: {}]   ;;  %s1096_s5 = inlined_call_operand.vmem [shape: f32[64,32], index: 5, kind: input, shape index: {}]   ;;  %s1097_s6 = inlined_call_operand.vmem [shape: f32[1,32], index: 6, kind: input, shape index: {}]   ;;  %s1098_s7 = inlined_call_operand.hbm [shape: f32[16,32], index: 7, kind: output, shape index: {}]  }
   0x1   :  { %14 = vsyncpa [#allocation5 + $0x1], 0  ;;  %s931_s24 = smov 0   ;;  %s933_s25 = smov 0  }
   0x2   :  { %s935_s26 = smov 0   ;;  %s937_s27 = smov 0  }
   0x3   :  { %s939_s28 = smov 0   ;;  %s941_s29 = smov 0  }
   0x4 LB: > { %s687_s30 = sadd.s32 4294967295, %s886_s29   ;;  %s688_s8 = sadd.s32 4294967294, %s886_s29   ;;  %s886_s29 = sphi %s941_s29, %s20_s29   ;;  %s882_s28 = sphi %s939_s28, %s1105_s28   ;;  %s878_s27 = sphi %s937_s27, %s1104_s27   ;;  %s874_s26 = sphi %s935_s26, %s1103_s26   ;;  %s870_s25 = sphi %s933_s25, %s1102_s25   ;;  %s866_s24 = sphi %s931_s24, %s1101_s24  }
   0x5   : > { %s32_s9 = sadd.s32 1, %s882_s28  ;;  %s206_s10 = sadd.s32 1, %s874_s26 }
   0x6   : > { %p34_p0 = scmp.ge.s32.totalorder %s32_s9, 2  ;;  %p216_p1 = scmp.ne.s32.totalorder %s874_s26, %s870_s25 }
   0x7   : > { %p217_p2 = scmp.eq.s32.totalorder %s687_s30, 1  ;;  %p222_p3 = scmp.ne.s32.totalorder %s870_s25, %s866_s24 }
   0x8   : > { %s1107_s9 = smov (%p34_p0, %s32_s9), 0  ;;  %p223_p5 = scmp.eq.s32.totalorder %s688_s8, 1 }
   0x9   : > { %p971_p4 = por %p217_p2, %p216_p1  ;;  %s203_s12 = ssub.s32 %s882_s28, %s1107_s9 }
   0xa   : > { %p694_p6 = scmp.ge.s32.totalorder %s886_s29, 1  ;;  %p204_p7 = scmp.eq.s32.totalorder %s203_s12, 0 }
   0xb   : > { %p978_p8 = por %p223_p5, %p222_p3  ;;  %p279_p9 = scmp.lt.s32.totalorder %s886_s29, 3 }
   0xc   : > { %s984_s14 = scalar_select %p204_p7, %s874_s26, %s206_s10  }
   0xd   : > { %p280_p10 = pnand %p694_p6, %p279_p9 }
   0xe   : > { %p322_p11 = scmp.lt.s32.totalorder (!%p280_p10), %s878_s27, 1  ;;  %s319_s10 = sand.u32 (!%p280_p10), 1, %s870_s25  }
   0xf   : > { %283 = sbr.rel (%p280_p10) target bundleno = 617 (0x269), region = 48  ;;  %s695_s12 = sshll.u32 (!%p280_p10), %s319_s10, 3 }
  0x10   : > { %s890_s23 = smov (!%p280_p10), [#allocation4]  }
  0x11   : > { %s814_s30 = sshll.u32 (!%p280_p10), %s890_s23, 4  ;;  %s815_s30 = int_to_ptr.vmem [resolvable:$false] %s814_s30 }
  0x14   : > { %s323_s15 = scalar_select %p322_p11, %s878_s27, 1  ;;  %vm344_vm0 = vcmask 261120   ;;  %v699_v0 = vld [vmem:[%s1097_s6] ss:$0 sm:$0xff]  ;;  %v888_v6 = vmov 0.0   ;;  %v391_v7 = vld [vmem:[%s1094_s3 + $0x18] sm:$0xff] }
  0x15   : > { %721 = vmatprep.subr.mxu0 %v888_v6  ;;  %v390_v8 = vld [vmem:[%s1094_s3 + $0x10] sm:$0xff]  ;;  %732 = vmatprep.subr.mxu1 %v888_v6  ;;  %vm889_vm1 = vmmov 0   ;;  %v389_v9 = vld [vmem:[%s1094_s3 + $0x8] sm:$0xff]  ;;  %v388_v10 = vld [vmem:[%s1094_s3] sm:$0xff]  ;;  %vm483_vm2 = vcmask 523264  }
  0x16   : > { %s696_s16 = sshll.u32 %s323_s15, 3  ;;  %722 = vmatpush3.msra.mxu0 %v391_v7  ;;  %729 = vmatprep.mubr.msk.f32.mxu0 %vm889_vm1, %v888_v6  ;;  %v482_v11 = vld [vmem:[%s1096_s5 + $0x38] sm:$0xff]  ;;  %v481_v12 = vld [vmem:[%s1096_s5 + $0x30] sm:$0xff]  ;;  %v480_v13 = vld [vmem:[%s1096_s5 + $0x28] sm:$0xff]  ;;  %s704_s15 = sshll.u32 %s878_s27, 7 }
  0x17   : > { %s325_s21 = scalar_lea.vmem %s1091_s0, %s696_s16  ;;  %723 = vmatprep.subr.mxu0 %v888_v6  ;;  %748 = vmatprep.mubr.msk.f32.mxu1 %vm889_vm1, %v888_v6  ;;  %v479_v14 = vld [vmem:[%s1096_s5 + $0x20] sm:$0xff]  ;;  %v478_v15 = vld [vmem:[%s1096_s5 + $0x18] sm:$0xff]  ;;  %v477_v32 = vld [vmem:[%s1096_s5 + $0x10] sm:$0xff]  ;;  %s321_s16 = scalar_lea.vmem [#allocation4], %s695_s12 }
  0x18   : > { %v343_v1 = vld [vmem:[%s325_s21] sm:$0xff]  ;;  %724 = vmatpush3.msra.mxu0 %v390_v8  ;;  %733 = vmatpush3.msra.mxu1 %v482_v11  ;;  %v476_v33 = vld [vmem:[%s1096_s5 + $0x8] sm:$0xff]  ;;  %s578_s17 = sshll.u32 %s321_s16, 4  ;;  %s1050_s20 = scalar_lea.hbm %s1098_s7, %s704_s15  ;;  %s579_s17 = int_to_ptr.vmem [resolvable:$true] %s578_s17 }
  0x19   : > { %v345_v2 = vsel %vm344_vm0, %v343_v1, 0.0  ;;  %v385_v3 = vadd.f32 %v699_v0, %v343_v1  ;;  %v349_v4 = vmul.f32 %v343_v1, %v343_v1  ;;  %725 = vmatprep.subr.mxu0 %v888_v6  ;;  %734 = vmatprep.subr.mxu1 %v888_v6  ;;  %v697_v26 = vld [vmem:[%s1092_s1] ss:$0 sm:$0xff]  ;;  %s565_s21 = scalar_lea.sflag [#allocation5], %s319_s10  ;;  %s810_s22 = scalar_lea.vmem %s579_s17, 128 }
  0x1a   : > { %346 = vadd.xlane.f32.xlu0 %v345_v2  ;;  %726 = vmatpush3.msra.mxu0 %v389_v9  ;;  %v698_v28 = vld [vmem:[%s1093_s2] ss:$0 sm:$0xff]  ;;  %p811_p12 = scmp.ne.s32.totalorder %s579_s17, %s810_s22  ;;  %s816_s27 = scalar_lea.vmem %s815_s30, 256 }
  0x1b   : > { %386 = vst.msk [vmem:[#allocation3] sm:$0xff] %vm344_vm0, %v385_v3  ;;  %v350_v5 = vsel %vm344_vm0, %v349_v4, 0.0  ;;  %727 = vmatprep.subr.mxu0 %v888_v6  ;;  %735 = vmatpush3.msra.mxu1 %v481_v12  ;;  %v475_v34 = vld [vmem:[%s1096_s5] sm:$0xff]  ;;  %p817_p1 = scmp.lt.s32.totalorder %s579_s17, %s815_s30  ;;  %p818_p2 = scmp.lt.s32.totalorder %s816_s27, %s810_s22 }
  0x1c   : > { %728 = vmatpush3.msra.mxu0 %v388_v10  ;;  %736 = vmatprep.subr.mxu1 %v888_v6  ;;  %v700_v35 = vld [vmem:[%s1095_s4] ss:$0 sm:$0xff]  ;;  %p812_p13 = pnand %p811_p12, %p971_p4 }
  0x1d   : > { %737 = vmatpush3.msra.mxu1 %v480_v13  ;;  %p819_p3 = por %p818_p2, %p817_p1 }
  0x1e   : > { %351 = vadd.xlane.f32.xlu0 %v350_v5  ;;  %738 = vmatprep.subr.mxu1 %v888_v6  ;;  %p813_p0 = pneg %p812_p13 }
  0x1f   : > { %739 = vmatpush3.msra.mxu1 %v479_v14 }
  0x20   : > { %740 = vmatprep.subr.mxu1 %v888_v6  ;;  %p820_p5 = pnand %p819_p3, %p813_p0 }
  0x21   : > { %741 = vmatpush3.msra.mxu1 %v478_v15 }
  0x22   : > { %742 = vmatprep.subr.mxu1 %v888_v6  ;;  %v474_v40 = vld [vmem:[#allocation3] sm:$0xff] }
  0x23   : > { %743 = vmatpush3.msra.mxu1 %v477_v32 }
  0x24   : > { %744 = vmatprep.subr.mxu1 %v888_v6 }
  0x25   : > { %745 = vmatpush3.msra.mxu1 %v476_v33 }
  0x26   : > { %746 = vmatprep.subr.mxu1 %v888_v6 }
  0x27   : > { %747 = vmatpush3.msra.mxu1 %v475_v34 }
  0xa3   : > { %v347_v16 = vpop.xlane.xlu0 %346 }
  0xa4   : > { %v348_v17 = vmul.f32 0.03125, %v347_v16 }
  0xa6   : > { %v354_v19 = vmul.f32 %v348_v17, %v348_v17  ;;  %v357_v24 = vsub.f32 %v343_v1, %v348_v17 }
  0xa7   : > { %v352_v18 = vpop.xlane.xlu0 %351 }
  0xa8   : > { %v353_v20 = vmul.f32 0.03125, %v352_v18 }
  0xaa   : > { %v355_v21 = vsub.f32 %v353_v20, %v354_v19 }
  0xac   : > { %v356_v22 = vmax.f32 %v355_v21, 0.0 }
  0xae   : > { %v358_v23 = vadd.f32 1e-05, %v356_v22 }
  0xb0   : > { %808 = vrsqrt.f32 %v358_v23 }
  0xbd   : > { %v809_v25 = vpop.eup %808 }
  0xbe   : > { %v360_v27 = vmul.f32 %v809_v25, %v357_v24 }
  0xc0   : > { %v368_v29 = vmul.f32 %v697_v26, %v360_v27 }
  0xc2   : > { %v376_v30 = vadd.f32 %v698_v28, %v368_v29 }
  0xc4   : > { %377 = vst.msk [vmem:[#allocation2] sm:$0xff] %vm344_vm0, %v376_v30 }
  0xcb   : > { %v387_v31 = vld [vmem:[#allocation2] sm:$0xff] }
  0xcc   : > { %730 = vmatmul.mubr.msk.f32.vlgmr.msra.gmra.mxu0 %vm344_vm0, %v387_v31 }
 0x18c   : > { %v469_v36 = vpop.f32.mrf.mxu0 }
 0x18d   : > { %v470_v37 = vadd.f32 %v700_v35, %v469_v36 }
 0x18e   : > { %v731_v38 = vpop.f32.mrf.mxu0 }
 0x18f   : > { %v473_v39 = vmax.f32 %v470_v37, 0.0 }
 0x191   : > { %749 = vmatmul.mubr.msk.f32.vlgmr.msra.gmra.mxu1 %vm483_vm2, %v473_v39 }
 0x251   : > { %v553_v41 = vpop.f32.mrf.mxu1 }
 0x252   : > { %v557_v42 = vadd.f32 %v553_v41, %v474_v40 }
 0x253   : > { %v750_v43 = vpop.f32.mrf.mxu1 }
 0x254   : > { %558 = vst.msk [vmem:[#allocation3] sm:$0xff] %vm344_vm0, %v557_v42 }
 0x25b   : > { %v562_v44 = vld [vmem:[#allocation3] sm:$0xff] }
 0x25c   : > { %563 = vst.msk [vmem:[%s321_s16] sm:$0xff] %vm344_vm0, %v562_v44 }
 0x25d   : > { %823 = shalt.err (!%p820_p5)
}
 0x25e   : > { %s824_s8 = scalar_lea.hbm %s1050_s20, 128  ;;  %s828_s15 = scalar_lea.hbm %s1098_s7, 256 }
 0x25f   : > { %p825_p6 = scmp.ne.s32.totalorder %s1050_s20, %s824_s8  ;;  %p829_p10 = scmp.lt.s32.totalorder %s1050_s20, %s1098_s7 }
 0x260   : > { %p830_p11 = scmp.lt.s32.totalorder %s828_s15, %s824_s8 }
 0x261   : > { %p826_p7 = pnand %p825_p6, %p971_p4 }
 0x262   : > { %p831_p12 = por %p830_p11, %p829_p10 }
 0x263   : > { %p827_p9 = pneg %p826_p7 }
 0x265   : > { %p832_p13 = pnand %p831_p12, %p827_p9 }
 0x267   : > { %835 = shalt.err (!%p832_p13)
}
 0x268   : > { %751 = dma.vmem_to_hbm [thread:$0]  (%p971_p4), %s579_s17, 128, %s1050_s20, %s565_s21  }
 0x269 PF: > { %p757_p0 = scmp.ge.s32.totalorder %s886_s29, 2  ;;  %s590_s19 = sand.u32 1, %s866_s24  }
 0x26a   : > { %s591_s22 = scalar_lea.sflag [#allocation5], %s590_s19 }
 0x26b   : > { %p754_p1 = pnand %p757_p0, %p978_p8 }
 0x26d   : > { %p755_p2 = pneg %p754_p1 }
 0x26f   : > { %861 = dma.done.wait (%p755_p2), %s591_s22, 128  }
 0x270   : > { %863 = vsyncadd (%p755_p2), %s591_s22, 4294967168  ;;  %s20_s29 = sadd.s32 1, %s886_s29   ;;  %s1101_s24 = smov %s870_s25 }
 0x271   : > { %p17_p3 = scmp.ge.s32.totalorder %s20_s29, 4   ;;  %s1102_s25 = smov %s874_s26 }
 0x272   : > { %s1103_s26 = smov %s984_s14  ;;  %s1104_s27 = smov %s882_s28 }
 0x273   : > { %s1105_s28 = smov %s1107_s9  ;;  %19 = sbr.rel (!%p17_p3) target bundleno = 4 (0x4), region = 100 }
 0x278   :  { %596 = vsyncpa [#allocation5], 1 }
 0x279   :  { %598 = vsyncpa [#allocation5 + $0x1], 1 }

</bundles_post_ra>
